<compile_context>
chip_gen: v6e
topology: v6e:2x2x1
jax: 0.10.0
libtpu: 0.0.40
codegen_flags: <defaults>
</compile_context>

<pallas_src>
import functools

import jax
import jax.numpy as jnp
from jax.experimental import pallas as pl
from jax.experimental.pallas import tpu as pltpu

LANES = 128             # lane width (last dim of every block)
ACC_R = 8               # accumulator sublane rows
CHUNK_R = 256           # rows per inner accumulation chunk (32 f32 vregs)
DEFAULT_TILE_R = 8192   # target rows per grid step (4 MiB/input/step in f32)
NUM_SPLITS = 2          # leading "parallel" grid axis (v7x has 2 TensorCores)
SPLIT_MIN_ROWS = 1024   # don't bother splitting tiny inputs
VMEM_LIMIT_BYTES = 32 * 1024 * 1024


def _cdiv(a, b):
    return -(-a // b)


def _round_up(a, b):
    return _cdiv(a, b) * b


def _sublane_multiple(dtype):
    # f32 -> 8, bf16/f16 -> 16, int8/fp8 -> 32 sublane tiling.
    return max(8, 32 // jnp.dtype(dtype).itemsize)


def _iou_dice_kernel(x_ref, t_ref, out_ref, inter_acc, tot_acc, *,
                     rows_valid, tile_r, chunk_r, full_blocks, has_edge):
    c = pl.program_id(0)                 # split ("parallel"; one per TC on v7x)
    i = pl.program_id(1)                 # reduction step within the split
    nsteps = pl.num_programs(1)
    b = c * nsteps + i                   # global (unclamped) block index
    base_row = b * tile_r                # first row covered by this block

    @pl.when(i == 0)
    def _():
        inter_acc[...] = jnp.zeros_like(inter_acc)
        tot_acc[...] = jnp.zeros_like(tot_acc)

    n_chunks = tile_r // chunk_r
    shape3 = (chunk_r // ACC_R, ACC_R, LANES)

    def accumulate(masked):
        def body(j, carry):
            r0 = pl.multiple_of(j * chunk_r, chunk_r)
            x = x_ref[pl.ds(r0, chunk_r), :].astype(jnp.float32)
            t = t_ref[pl.ds(r0, chunk_r), :].astype(jnp.float32)
            # TODO(synk): on v7x confirm this stays a single EUP logistic op; if
            # it becomes exp + a full-precision divide, switch to jnp.exp(-x)
            # with pl.reciprocal(..., approx=True).
            s = jax.nn.sigmoid(x)
            if masked:
                # Row-index mask (never a flat element index -> no i32 overflow).
                # Keep the select form: garbage/NaN rows of a partial edge block
                # must not propagate through a multiply.
                row = jax.lax.broadcasted_iota(jnp.int32, (chunk_r, LANES), 0)
                valid = (base_row + r0 + row) < rows_valid
                s = jnp.where(valid, s, 0.0)
                t = jnp.where(valid, t, 0.0)
            # (8, 128)-shaped partial sums: pure VPU adds in the hot loop; the
            # single cross-lane reduction happens once, in the wrapper.
            inter_acc[...] += (s * t).reshape(shape3).sum(axis=0)
            tot_acc[...] += (s + t).reshape(shape3).sum(axis=0)
            return carry

        jax.lax.fori_loop(0, n_chunks, body, 0, unroll=True)

    if has_edge:
        @pl.when(b < full_blocks)
        def _():
            accumulate(masked=False)

        @pl.when(b >= full_blocks)
        def _():
            accumulate(masked=True)
    else:
        accumulate(masked=False)

    # Per-split partial sums -> lane-dense output block (combined in the wrapper).
    @pl.when(i == nsteps - 1)
    def _():
        out_ref[0, 0] = inter_acc[...]
        out_ref[0, 1] = tot_acc[...]


def iou_dice_loss(inputs, targets, alpha=0.5, beta=0.5):
    """JAX/Pallas equivalent of IoUDiceLoss(params, alpha, beta)(inputs, targets)."""
    x_flat = inputs.reshape(-1)          # keep native dtype; kernel widens to f32
    t_flat = targets.reshape(-1)
    n = x_flat.shape[0]

    rows = n // LANES                    # full 128-lane rows handled by the kernel
    n_main = rows * LANES
    tail = n - n_main                    # <=127 ragged elements handled out-of-band

    inter = jnp.float32(0.0)
    tot = jnp.float32(0.0)

    if rows > 0:
        sub_mult = max(_sublane_multiple(x_flat.dtype),
                       _sublane_multiple(t_flat.dtype))
        num_splits = NUM_SPLITS if rows >= SPLIT_MIN_ROWS else 1
        # Block count is a multiple of num_splits (no phantom blocks wasted on the
        # serial 1-TC path); each block targets ~DEFAULT_TILE_R rows.
        n_blocks = num_splits * max(1, _cdiv(_cdiv(rows, num_splits),
                                             DEFAULT_TILE_R))
        quantum = max(sub_mult, CHUNK_R) if rows >= CHUNK_R else sub_mult
        tile_r = _round_up(_cdiv(rows, n_blocks), quantum)
        per_split = n_blocks // num_splits
        chunk_r = CHUNK_R if tile_r % CHUNK_R == 0 else tile_r
        full_blocks = rows // tile_r                 # blocks needing no masking
        has_edge = n_blocks > full_blocks
        max_block = max(_cdiv(rows, tile_r) - 1, 0)  # clamp for phantom blocks

        # TODO(synk): when n % 128 != 0 this prefix slice still costs one extra
        # pass over HBM (XLA materializes the slice); a truly zero-copy ragged
        # path would need a manual-DMA 1-D layout.
        x_main = x_flat[:n_main] if tail else x_flat
        t_main = t_flat[:n_main] if tail else t_flat
        x2 = x_main.reshape(rows, LANES)
        t2 = t_main.reshape(rows, LANES)

        kernel = functools.partial(
            _iou_dice_kernel, rows_valid=int(rows), tile_r=int(tile_r),
            chunk_r=int(chunk_r), full_blocks=int(full_blocks),
            has_edge=bool(has_edge))

        def in_map(c, i):
            return (jnp.minimum(c * per_split + i, max_block), 0)

        parts = pl.pallas_call(
            kernel,
            out_shape=jax.ShapeDtypeStruct((num_splits, 2, ACC_R, LANES),
                                           jnp.float32),
            grid_spec=pltpu.PrefetchScalarGridSpec(
                num_scalar_prefetch=0,
                grid=(num_splits, per_split),
                in_specs=[
                    pl.BlockSpec((tile_r, LANES), in_map),
                    pl.BlockSpec((tile_r, LANES), in_map),
                ],
                out_specs=pl.BlockSpec((1, 2, ACC_R, LANES),
                                       lambda c, i: (c, 0, 0, 0)),
                scratch_shapes=[
                    pltpu.VMEM((ACC_R, LANES), jnp.float32),  # sum(sigmoid(x)*t)
                    pltpu.VMEM((ACC_R, LANES), jnp.float32),  # sum(sigmoid(x)+t)
                ],
            ),
            compiler_params=pltpu.CompilerParams(
                dimension_semantics=("parallel", "arbitrary"),
                vmem_limit_bytes=VMEM_LIMIT_BYTES),
        )(x2, t2)

        inter = jnp.sum(parts[:, 0])
        tot = jnp.sum(parts[:, 1])

    if tail:
        xt = x_flat[n_main:].astype(jnp.float32)
        tt = t_flat[n_main:].astype(jnp.float32)
        st = jax.nn.sigmoid(xt)
        inter = inter + jnp.sum(st * tt)
        tot = tot + jnp.sum(st + tt)

    # Tiny scalar finalize (matches the torch reference exactly).
    union = tot - inter
    iou_loss = 1.0 - (inter + 1.0) / (union + 1.0)             # IoULoss, smooth=1
    dice = (2.0 * inter + 1e-5) / (tot + 1e-5)                 # DiceLoss, smooth=1e-5
    dl = 1.0 - dice
    dice_loss = jnp.log((jnp.exp(dl) + jnp.exp(-dl)) / 2.0)    # log-cosh of (1-dice)
    return alpha * iou_loss + beta * dice_loss


def _reference(inputs, targets, alpha=0.5, beta=0.5):
    s = jax.nn.sigmoid(inputs.reshape(-1).astype(jnp.float32))
    t = targets.reshape(-1).astype(jnp.float32)
    inter = jnp.sum(s * t)
    union = jnp.sum(s) + jnp.sum(t) - inter
    iou_loss = 1.0 - (inter + 1.0) / (union + 1.0)
    dice = (2.0 * inter + 1e-5) / (jnp.sum(s) + jnp.sum(t) + 1e-5)
    dl = 1.0 - dice
    dice_loss = jnp.log((jnp.exp(dl) + jnp.exp(-dl)) / 2.0)
    return alpha * iou_loss + beta * dice_loss


if __name__ == "__main__":
    key = jax.random.PRNGKey(0)
    k1, k2, k3, k4, k5, k6, k7, k8 = jax.random.split(key, 8)

    # 1) Small aligned NCHW logits + binary targets (seg-mask style).
    inputs = jax.random.normal(k1, (2, 4, 16, 16), dtype=jnp.float32)
    targets = (jax.random.uniform(k2, (2, 4, 16, 16)) > 0.5).astype(jnp.float32)
    loss = jax.block_until_ready(iou_dice_loss(inputs, targets, 0.5, 0.5))
    ref = _reference(inputs, targets, 0.5, 0.5)
    assert jnp.allclose(loss, ref, atol=1e-5, rtol=1e-5), (loss, ref)

    # 2) Odd-sized: exercises the unpadded-prefix path + out-of-band <128 tail.
    inputs2 = jax.random.normal(k3, (3, 5, 17, 19), dtype=jnp.float32)
    targets2 = (jax.random.uniform(k4, (3, 5, 17, 19)) > 0.5).astype(jnp.float32)
    loss2 = jax.block_until_ready(iou_dice_loss(inputs2, targets2, 0.5, 0.5))
    ref2 = _reference(inputs2, targets2, 0.5, 0.5)
    assert jnp.allclose(loss2, ref2, atol=1e-5, rtol=1e-5), (loss2, ref2)

    # 3) Larger input: 2-way "parallel" split (v7x dual-TC path) + masked edge block.
    inputs3 = jax.random.normal(k5, (2, 4, 144, 144), dtype=jnp.float32)
    targets3 = (jax.random.uniform(k6, (2, 4, 144, 144)) > 0.5).astype(jnp.float32)
    loss3 = jax.block_until_ready(iou_dice_loss(inputs3, targets3, 0.5, 0.5))
    ref3 = _reference(inputs3, targets3, 0.5, 0.5)
    assert jnp.allclose(loss3, ref3, atol=1e-5, rtol=1e-5), (loss3, ref3)

    # 4) bf16 logits / f32 targets: narrow-dtype path with 16-row sublane tiling.
    inputs4 = jax.random.normal(k7, (2, 4, 16, 16), dtype=jnp.bfloat16)
    targets4 = (jax.random.uniform(k8, (2, 4, 16, 16)) > 0.5).astype(jnp.float32)
    loss4 = jax.block_until_ready(iou_dice_loss(inputs4, targets4, 0.5, 0.5))
    ref4 = _reference(inputs4, targets4, 0.5, 0.5)
    assert jnp.allclose(loss4, ref4, atol=1e-5, rtol=1e-5), (loss4, ref4)

    print("KERNEL_OK")
</pallas_src>

<mosaic_0001>
module attributes {stable_mosaic.version = 11 : i64} {
  func.func @_iou_dice_kernel(%arg0: i32, %arg1: i32, %arg2: memref<16x128xf32, #tpu.memory_space<vmem>>, %arg3: memref<16x128xf32, #tpu.memory_space<vmem>>, %arg4: memref<1x2x8x128xf32, #tpu.memory_space<vmem>>, %arg5: memref<8x128xf32, #tpu.memory_space<vmem>>, %arg6: memref<8x128xf32, #tpu.memory_space<vmem>>) attributes {dimension_semantics = [#tpu.dimension_semantics<parallel>, #tpu.dimension_semantics<arbitrary>], iteration_bounds = array<i64: 1, 1>, scalar_prefetch = 0 : i64, scratch_operands = 2 : i64, tpu.core_type = #tpu.core_type<tc>, window_params = [{transform_indices = @transform_0, window_bounds = array<i64: 16, 128>}, {transform_indices = @transform_1, window_bounds = array<i64: 16, 128>}, {transform_indices = @transform_2, window_bounds = array<i64: 1, 2, 8, 128>}]} {
    %c0_i32 = arith.constant 0 : i32
    %0 = arith.cmpi eq, %arg1, %c0_i32 : i32
    %1 = arith.extui %0 : i1 to i32
    %c0_i32_0 = arith.constant 0 : i32
    %2 = arith.cmpi ne, %1, %c0_i32_0 : i32
    scf.if %2 {
      %cst_15 = arith.constant 0.000000e+00 : f32
      %29 = vector.broadcast %cst_15 : f32 to vector<8x128xf32>
      %c0_16 = arith.constant 0 : index
      %c0_17 = arith.constant 0 : index
      %30 = vector.load %arg5[%c0_16, %c0_17] : memref<8x128xf32, #tpu.memory_space<vmem>>, vector<8x128xf32>
      tpu.vector_store %arg5[%c0_16, %c0_17], %29 {strides = array<i32>} : memref<8x128xf32, #tpu.memory_space<vmem>>, vector<8x128xf32>,
      %cst_18 = arith.constant 0.000000e+00 : f32
      %31 = vector.broadcast %cst_18 : f32 to vector<8x128xf32>
      %c0_19 = arith.constant 0 : index
      %c0_20 = arith.constant 0 : index
      %32 = vector.load %arg6[%c0_19, %c0_20] : memref<8x128xf32, #tpu.memory_space<vmem>>, vector<8x128xf32>
      tpu.vector_store %arg6[%c0_19, %c0_20], %31 {strides = array<i32>} : memref<8x128xf32, #tpu.memory_space<vmem>>, vector<8x128xf32>,
    } else {
    }
    %c0_i32_1 = arith.constant 0 : i32
    %c16_i32 = arith.constant 16 : i32
    %3 = arith.muli %c0_i32_1, %c16_i32 : i32
    %4 = tpu.assume_multiple %3, 16 : i32
    %5 = arith.index_cast %4 : i32 to index
    %c0 = arith.constant 0 : index
    %6 = vector.load %arg2[%5, %c0] : memref<16x128xf32, #tpu.memory_space<vmem>>, vector<16x128xf32>
    %7 = arith.index_cast %4 : i32 to index
    %c0_2 = arith.constant 0 : index
    %8 = vector.load %arg3[%7, %c0_2] : memref<16x128xf32, #tpu.memory_space<vmem>>, vector<16x128xf32>
    %9 = arith.negf %6 : vector<16x128xf32>
    %10 = math.exp %9 : vector<16x128xf32>
    %cst = arith.constant 1.000000e+00 : f32
    %11 = vector.broadcast %cst : f32 to vector<16x128xf32>
    %12 = arith.addf %11, %10 : vector<16x128xf32>
    %13 = arith.divf %11, %12 : vector<16x128xf32>
    %c0_3 = arith.constant 0 : index
    %c0_4 = arith.constant 0 : index
    %14 = vector.load %arg5[%c0_3, %c0_4] : memref<8x128xf32, #tpu.memory_space<vmem>>, vector<8x128xf32>
    %15 = arith.mulf %13, %8 : vector<16x128xf32>
    %16 = vector.shape_cast %15 : vector<16x128xf32> to vector<2x8x128xf32>
    %cst_5 = arith.constant dense<0.000000e+00> : vector<8x128xf32>
    %17 = vector.multi_reduction <add>, %16, %cst_5 [0] : vector<2x8x128xf32> to vector<8x128xf32>
    %18 = arith.addf %14, %17 : vector<8x128xf32>
    %c0_6 = arith.constant 0 : index
    %c0_7 = arith.constant 0 : index
    %19 = vector.load %arg5[%c0_6, %c0_7] : memref<8x128xf32, #tpu.memory_space<vmem>>, vector<8x128xf32>
    tpu.vector_store %arg5[%c0_6, %c0_7], %18 {strides = array<i32>} : memref<8x128xf32, #tpu.memory_space<vmem>>, vector<8x128xf32>,
    %c0_8 = arith.constant 0 : index
    %c0_9 = arith.constant 0 : index
    %20 = vector.load %arg6[%c0_8, %c0_9] : memref<8x128xf32, #tpu.memory_space<vmem>>, vector<8x128xf32>
    %21 = arith.addf %13, %8 : vector<16x128xf32>
    %22 = vector.shape_cast %21 : vector<16x128xf32> to vector<2x8x128xf32>
    %cst_10 = arith.constant dense<0.000000e+00> : vector<8x128xf32>
    %23 = vector.multi_reduction <add>, %22, %cst_10 [0] : vector<2x8x128xf32> to vector<8x128xf32>
    %24 = arith.addf %20, %23 : vector<8x128xf32>
    %c0_11 = arith.constant 0 : index
    %c0_12 = arith.constant 0 : index
    %25 = vector.load %arg6[%c0_11, %c0_12] : memref<8x128xf32, #tpu.memory_space<vmem>>, vector<8x128xf32>
    tpu.vector_store %arg6[%c0_11, %c0_12], %24 {strides = array<i32>} : memref<8x128xf32, #tpu.memory_space<vmem>>, vector<8x128xf32>,
    %c1_i32 = arith.constant 1 : i32
    %c0_i32_13 = arith.constant 0 : i32
    %26 = arith.cmpi eq, %arg1, %c0_i32_13 : i32
    %27 = arith.extui %26 : i1 to i32
    %c0_i32_14 = arith.constant 0 : i32
    %28 = arith.cmpi ne, %27, %c0_i32_14 : i32
    scf.if %28 {
      %c0_15 = arith.constant 0 : index
      %c0_16 = arith.constant 0 : index
      %29 = vector.load %arg5[%c0_15, %c0_16] : memref<8x128xf32, #tpu.memory_space<vmem>>, vector<8x128xf32>
      %c0_17 = arith.constant 0 : index
      %c0_18 = arith.constant 0 : index
      %c0_19 = arith.constant 0 : index
      %c0_20 = arith.constant 0 : index
      %30 = vector.load %arg4[%c0_17, %c0_18, %c0_19, %c0_20] : memref<1x2x8x128xf32, #tpu.memory_space<vmem>>, vector<1x1x8x128xf32>
      %31 = vector.shape_cast %30 : vector<1x1x8x128xf32> to vector<8x128xf32>
      %32 = vector.shape_cast %29 : vector<8x128xf32> to vector<1x1x8x128xf32>
      tpu.vector_store %arg4[%c0_17, %c0_18, %c0_19, %c0_20], %32 {strides = array<i32>} : memref<1x2x8x128xf32, #tpu.memory_space<vmem>>, vector<1x1x8x128xf32>,
      %c0_21 = arith.constant 0 : index
      %c0_22 = arith.constant 0 : index
      %33 = vector.load %arg6[%c0_21, %c0_22] : memref<8x128xf32, #tpu.memory_space<vmem>>, vector<8x128xf32>
      %c0_23 = arith.constant 0 : index
      %c1 = arith.constant 1 : index
      %c0_24 = arith.constant 0 : index
      %c0_25 = arith.constant 0 : index
      %34 = vector.load %arg4[%c0_23, %c1, %c0_24, %c0_25] : memref<1x2x8x128xf32, #tpu.memory_space<vmem>>, vector<1x1x8x128xf32>
      %35 = vector.shape_cast %34 : vector<1x1x8x128xf32> to vector<8x128xf32>
      %36 = vector.shape_cast %33 : vector<8x128xf32> to vector<1x1x8x128xf32>
      tpu.vector_store %arg4[%c0_23, %c1, %c0_24, %c0_25], %36 {strides = array<i32>} : memref<1x2x8x128xf32, #tpu.memory_space<vmem>>, vector<1x1x8x128xf32>,
    } else {
    }
    return
  }
  func.func @transform_0(%arg0: i32, %arg1: i32) -> (i32, i32) {
    %c1_i32 = arith.constant 1 : i32
    %0 = arith.muli %arg0, %c1_i32 : i32
    %1 = arith.addi %0, %arg1 : i32
    %c0_i32 = arith.constant 0 : i32
    %2 = arith.minsi %1, %c0_i32 : i32
    %c0_i32_0 = arith.constant 0 : i32
    %c0_i32_1 = arith.constant 0 : i32
    return %2, %c0_i32_0 : i32, i32
  }
  func.func @transform_1(%arg0: i32, %arg1: i32) -> (i32, i32) {
    %c1_i32 = arith.constant 1 : i32
    %0 = arith.muli %arg0, %c1_i32 : i32
    %1 = arith.addi %0, %arg1 : i32
    %c0_i32 = arith.constant 0 : i32
    %2 = arith.minsi %1, %c0_i32 : i32
    %c0_i32_0 = arith.constant 0 : i32
    %c0_i32_1 = arith.constant 0 : i32
    return %2, %c0_i32_0 : i32, i32
  }
  func.func @transform_2(%arg0: i32, %arg1: i32) -> (i32, i32, i32, i32) {
    %c0_i32 = arith.constant 0 : i32
    %c0_i32_0 = arith.constant 0 : i32
    %c0_i32_1 = arith.constant 0 : i32
    %c0_i32_2 = arith.constant 0 : i32
    return %arg0, %c0_i32, %c0_i32_0, %c0_i32_1 : i32, i32, i32, i32
  }
}

</mosaic_0001>

<bundles_post_ra>
// kernel: tpu_custom_call.1
= control target key start
LH: loop header
LB: loop body
LE: loop exit
PB: predicated region body
PF: predicated region fallthrough
CT: control target
= control target key end

     0   :  { %7 = vsyncpa [#allocation5], 0  ;;  %s243_s0 = inlined_call_operand.hbm [shape: f32[16,128], index: 0, kind: input, shape index: {}]   ;;  %s244_s1 = inlined_call_operand.hbm [shape: f32[16,128], index: 1, kind: input, shape index: {}]   ;;  %s245_s2 = inlined_call_operand.hbm [shape: f32[1,2,8,128], index: 2, kind: output, shape index: {}]  }
   0x1   :  { %8 = vsyncpa [#allocation8], 0 }
   0x2   :  { %9 = vsyncpa [#allocation6], 0  ;;  %s205_s9 = smov [#allocation4]  }
   0x3   :  { %s21_s10 = sshll.u32 %s205_s9, 4  ;;  %s22_s10 = int_to_ptr.vmem [resolvable:$true] %s21_s10 }
   0x4   :  { %s147_s11 = scalar_lea.vmem %s22_s10, 256  ;;  %p152_p1 = scmp.lt.s32.totalorder %s22_s10, %s22_s10 }
   0x5   :  { %p148_p0 = scmp.ne.s32.totalorder %s22_s10, %s147_s11  ;;  %p153_p2 = scmp.lt.s32.totalorder %s147_s11, %s147_s11 }
   0x7   :  { %p154_p3 = por %p153_p2, %p152_p1 }
   0x9   :  { %p155_p4 = pnand %p154_p3, %p148_p0 }
   0xb   :  { %158 = shalt.err (!%p155_p4)
}
   0xc   :  { %s206_s12 = smov 128   ;;  %s207_s13 = smov 8  }
   0xd   :  { %27 = dma.hbm_to_vmem [thread:$0]  %s243_s0, 256, %s22_s10, [#allocation5], %s206_s12, %s206_s12, %s207_s13  }
   0xe   :  { %s208_s16 = smov [#allocation7]  }
   0xf   :  { %s39_s17 = sshll.u32 %s208_s16, 4  ;;  %s40_s17 = int_to_ptr.vmem [resolvable:$true] %s39_s17 }
  0x10   :  { %s167_s18 = scalar_lea.vmem %s40_s17, 256  ;;  %p172_p6 = scmp.lt.s32.totalorder %s40_s17, %s40_s17 }
  0x11   :  { %p168_p5 = scmp.ne.s32.totalorder %s40_s17, %s167_s18  ;;  %p173_p7 = scmp.lt.s32.totalorder %s167_s18, %s167_s18 }
  0x13   :  { %p174_p8 = por %p173_p7, %p172_p6 }
  0x15   :  { %p175_p9 = pnand %p174_p8, %p168_p5 }
  0x17   :  { %178 = shalt.err (!%p175_p9)
}
  0x18   :  { %45 = dma.hbm_to_vmem [thread:$0]  %s244_s1, 256, %s40_s17, [#allocation8], %s206_s12, %s206_s12, %s207_s13  }
  0x19   :  { %199 = dma.done.wait [#allocation5], 256  }
  0x1a   :  { %200 = vsyncadd [#allocation5], 4294967040 }
  0x1b   :  { %201 = dma.done.wait [#allocation8], 256  }
  0x1c   :  { %202 = vsyncadd [#allocation8], 4294967040  ;;  %v66_v0 = vld [vmem:[#allocation4] sm:$0xff]  ;;  %v67_v1 = vld [vmem:[#allocation4 + $0x8] sm:$0xff]  ;;  %s209_s0 = smov [#allocation9]  }
  0x1d   :  { %v124_v2 = vmul.f32 -1.442695, %v66_v0  ;;  %v125_v3 = vmul.f32 -1.442695, %v67_v1  ;;  %v68_v8 = vld [vmem:[#allocation7] sm:$0xff]  ;;  %v69_v9 = vld [vmem:[#allocation7 + $0x8] sm:$0xff] }
  0x1e   :  { %s107_s1 = sshll.u32 %s209_s0, 4  ;;  %s108_s1 = int_to_ptr.vmem [resolvable:$true] %s107_s1 }
  0x1f   :  { %131 = vpow2.f32 %v124_v2  ;;  %s179_s21 = scalar_lea.vmem %s108_s1, 256  ;;  %p184_p11 = scmp.lt.s32.totalorder %s108_s1, %s108_s1 }
  0x20   :  { %133 = vpow2.f32 %v125_v3  ;;  %p180_p10 = scmp.ne.s32.totalorder %s108_s1, %s179_s21  ;;  %p185_p12 = scmp.lt.s32.totalorder %s179_s21, %s179_s21 }
  0x22   :  { %p186_p13 = por %p185_p12, %p184_p11 }
  0x24   :  { %p187_p0 = pnand %p186_p13, %p180_p10 }
  0x2c   :  { %v132_v4 = vpop.eup %131 }
  0x2d   :  { %v134_v5 = vpop.eup %133  ;;  %v76_v6 = vadd.f32 1.0, %v132_v4 }
  0x2e   :  { %v77_v7 = vadd.f32 1.0, %v134_v5 }
  0x2f   :  { %135 = vrcp.f32 %v76_v6 }
  0x30   :  { %137 = vrcp.f32 %v77_v7 }
  0x3c   :  { %v136_v10 = vpop.eup %135 }
  0x3d   :  { %v138_v11 = vpop.eup %137  ;;  %v83_v12 = vmul.f32 %v136_v10, %v68_v8  ;;  %v89_v13 = vadd.f32 %v136_v10, %v68_v8 }
  0x3e   :  { %v84_v14 = vmul.f32 %v138_v11, %v69_v9  ;;  %v90_v15 = vadd.f32 %v138_v11, %v69_v9 }
  0x40   :  { %v85_v16 = vadd.f32 %v84_v14, %v83_v12  ;;  %v91_v17 = vadd.f32 %v90_v15, %v89_v13 }
  0x42   :  { %98 = vst [vmem:[#allocation9] sm:$0xff] %v85_v16  ;;  %101 = vst [vmem:[#allocation9 + $0x8] sm:$0xff] %v91_v17 }
  0x43   :  { %190 = shalt.err (!%p187_p0)
}
  0x44   :  { %113 = dma.vmem_to_hbm [thread:$0]  %s108_s1, 256, %s245_s2, [#allocation6], %s206_s12, %s206_s12, %s207_s13  }
  0x45   :  { %203 = dma.done.wait [#allocation6], 256  }
  0x46   :  { %204 = vsyncadd [#allocation6], 4294967040 }
  0x47   :  { %117 = vsyncpa [#allocation5], 1 }
  0x48   :  { %118 = vsyncpa [#allocation8], 1 }
  0x49   :  { %119 = vsyncpa [#allocation6], 1 }

</bundles_post_ra>
